<compile_context>
chip_gen: v7x
topology: tpu7x:2x2x1
jax: 0.10.0
libtpu: 0.0.40
codegen_flags: <defaults>
</compile_context>

<pallas_src>
import functools

import jax
import jax.numpy as jnp
from jax.experimental import pallas as pl
from jax.experimental.pallas import tpu as pltpu

EPS = 1e-6
SCALE_DIAG_MIN_MAX = (-20.0, 2.0)
LANE = 128  # TPU vreg lane width


def _round_up(x, m):
    return ((x + m - 1) // m) * m


# ----------------------------------------------------------------------------
# Kernel
# ----------------------------------------------------------------------------
def _bc_forward_kernel(state_ref, w1_ref, b1_ref, w2_ref, b2_ref,
                       wh_ref, bh_ref, noise_ref,
                       det_ref, sq_ref, logp_ref, mean_ref, var_ref,
                       *, action_dim, ap):
    x = state_ref[...]

    # --- MLP trunk: Linear -> ReLU -> Linear -> ReLU (MXU matmuls) ---
    h = jnp.dot(x, w1_ref[...], preferred_element_type=jnp.float32) + b1_ref[...]
    h = jnp.maximum(h, 0.0)
    h = jnp.dot(h, w2_ref[...], preferred_element_type=jnp.float32) + b2_ref[...]
    h = jnp.maximum(h, 0.0)

    # --- fused heads: one (hidden, 2*ap) matmul, then split mean / log_std ---
    heads = jnp.dot(h, wh_ref[...], preferred_element_type=jnp.float32) + bh_ref[...]
    mean = heads[:, :ap]
    log_std = jnp.clip(heads[:, ap:], SCALE_DIAG_MIN_MAX[0], SCALE_DIAG_MIN_MAX[1])
    # Padded lanes carry zero weights/bias -> log_std == 0 there (clip keeps 0).

    # std_dev directly from log_std (no exp->sqrt round trip); var for the output.
    std_dev = jnp.exp(0.5 * log_std)
    var = std_dev * std_dev

    eps = noise_ref[...]                     # zero in padded lanes
    sample = mean + std_dev * eps

    # Diagonal-covariance MVN log-prob of `sample`, simplified:
    #   (sample-mean)^2/var == eps^2,  log(var) == clamped log_std.
    # Padded lanes contribute exactly 0 to both sums.
    log_2pi = jnp.log(2.0 * jnp.pi).astype(jnp.float32)
    logp = (-0.5 * jnp.sum(eps * eps, axis=-1, keepdims=True)
            - 0.5 * jnp.sum(log_std, axis=-1, keepdims=True)
            - 0.5 * action_dim * log_2pi)

    # --- squashing ---
    squashed = jnp.tanh(sample)
    log1msq = jnp.log(1.0 - squashed * squashed + EPS)
    # Mask padded lanes so they don't add log(1+EPS) per lane to the sum.
    lane = jax.lax.broadcasted_iota(jnp.int32, log1msq.shape, 1)
    log1msq = jnp.where(lane < action_dim, log1msq, 0.0)
    squashed_logp = logp - jnp.sum(log1msq, axis=-1, keepdims=True)

    # Lane-dense stores (every output is a full 128-lane slab).
    det_ref[...] = jnp.tanh(mean)
    sq_ref[...] = squashed
    logp_ref[...] = jnp.broadcast_to(squashed_logp, logp_ref.shape)
    mean_ref[...] = mean
    var_ref[...] = var


# ----------------------------------------------------------------------------
# Parameter preparation (pad + fuse heads) — do once at init time.
# ----------------------------------------------------------------------------
def prepare_params(params, action_dim):
    w1, b1 = params["w1"], params["b1"]
    w2, b2 = params["w2"], params["b2"]
    wmu, bmu = params["wmu"], params["bmu"]
    wls, bls = params["wls"], params["bls"]

    state_dim, hidden = w1.shape
    hp = _round_up(hidden, LANE)
    ap = _round_up(action_dim, LANE)

    def pad2(a, rows, cols):
        return jnp.pad(a, ((0, rows - a.shape[0]), (0, cols - a.shape[1])))

    wh = jnp.concatenate([pad2(wmu, hp, ap), pad2(wls, hp, ap)], axis=1)
    bh = jnp.concatenate([pad2(bmu, 1, ap), pad2(bls, 1, ap)], axis=1)

    return dict(
        w1=pad2(w1, state_dim, hp), b1=pad2(b1, 1, hp),
        w2=pad2(w2, hp, hp), b2=pad2(b2, 1, hp),
        wh=wh, bh=bh,
        hp=hp, ap=ap, action_dim=action_dim,
    )


# ----------------------------------------------------------------------------
# Wrapper
# ----------------------------------------------------------------------------
def gaussian_reverse_bc_forward(state, prepped, noise):
    """Full forward pass. Returns (det_action, squashed_action, squashed_logp,
    (mean, var)) where var is the covariance diagonal (matches the torch code's
    use of `std` as cov diag)."""
    B, S = state.shape
    A = prepped["action_dim"]
    ap = prepped["ap"]
    hp = prepped["hp"]

    # Batch tile: multiple of 8 sublanes, capped so double-buffered tiles fit
    # comfortably inside v7x's 64 MiB VMEM as well as v5e/v6e's 128 MiB.
    TB = min(_round_up(B, 8), 512)
    B_pad = _round_up(B, TB)
    n_tiles = B_pad // TB

    state_p = jnp.pad(state.astype(jnp.float32), ((0, B_pad - B), (0, 0)))
    noise_p = jnp.pad(noise.astype(jnp.float32), ((0, B_pad - B), (0, ap - A)))

    def full(shape):            # weight/bias: VMEM-resident across all tiles
        return pl.BlockSpec(shape, lambda i: (0, 0))

    def row_tile(width):        # batch-tiled arrays
        return pl.BlockSpec((TB, width), lambda i: (i, 0))

    kernel = functools.partial(_bc_forward_kernel, action_dim=A, ap=ap)

    out_shape = tuple(jax.ShapeDtypeStruct((B_pad, ap), jnp.float32)
                      for _ in range(5))
    out_specs = tuple(row_tile(ap) for _ in range(5))

    det, sq, logp, mean, var = pl.pallas_call(
        kernel,
        out_shape=out_shape,
        grid=(n_tiles,),
        in_specs=[
            row_tile(S),                        # state
            full((S, hp)), full((1, hp)),       # layer 1
            full((hp, hp)), full((1, hp)),      # layer 2
            full((hp, 2 * ap)), full((1, 2 * ap)),  # fused heads
            row_tile(ap),                       # noise
        ],
        out_specs=out_specs,
        compiler_params=pltpu.CompilerParams(
            dimension_semantics=("parallel",)),
    )(state_p, prepped["w1"], prepped["b1"], prepped["w2"], prepped["b2"],
      prepped["wh"], prepped["bh"], noise_p)

    return (det[:B, :A], sq[:B, :A], logp[:B, 0], (mean[:B, :A], var[:B, :A]))


# ----------------------------------------------------------------------------
# Synthetic init + pure-JAX reference (for correctness check)
# ----------------------------------------------------------------------------
def init_params(key, state_dim, hidden_dim, action_dim):
    ks = jax.random.split(key, 8)

    def lin(kw, kb, fan_in, fan_out):
        bound = 1.0 / jnp.sqrt(fan_in)
        w = jax.random.uniform(kw, (fan_in, fan_out), jnp.float32, -bound, bound)
        b = jax.random.uniform(kb, (1, fan_out), jnp.float32, -bound, bound)
        return w, b

    w1, b1 = lin(ks[0], ks[1], state_dim, hidden_dim)
    w2, b2 = lin(ks[2], ks[3], hidden_dim, hidden_dim)
    wmu, bmu = lin(ks[4], ks[5], hidden_dim, action_dim)
    wls, bls = lin(ks[6], ks[7], hidden_dim, action_dim)
    return dict(w1=w1, b1=b1, w2=w2, b2=b2, wmu=wmu, bmu=bmu, wls=wls, bls=bls)


def _reference(state, params, noise):
    hi = jax.lax.Precision.HIGHEST
    h = jnp.maximum(jnp.dot(state, params["w1"], precision=hi) + params["b1"], 0.0)
    h = jnp.maximum(jnp.dot(h, params["w2"], precision=hi) + params["b2"], 0.0)
    mean = jnp.dot(h, params["wmu"], precision=hi) + params["bmu"]
    log_std = jnp.dot(h, params["wls"], precision=hi) + params["bls"]
    var = jnp.exp(jnp.clip(log_std, SCALE_DIAG_MIN_MAX[0], SCALE_DIAG_MIN_MAX[1]))
    sample = mean + jnp.sqrt(var) * noise
    logp = (-0.5 * jnp.sum((sample - mean) ** 2 / var, axis=-1)
            - 0.5 * jnp.sum(jnp.log(var), axis=-1)
            - 0.5 * mean.shape[-1] * jnp.log(2.0 * jnp.pi))
    sq = jnp.tanh(sample)
    sq_logp = logp - jnp.sum(jnp.log(1.0 - sq ** 2 + EPS), axis=-1)
    return jnp.tanh(mean), sq, sq_logp, mean, var


if __name__ == "__main__":
    batch, state_dim, hidden_dim, action_dim = 8, 16, 32, 4

    key = jax.random.PRNGKey(0)
    k_params, k_state, k_noise = jax.random.split(key, 3)

    params = init_params(k_params, state_dim, hidden_dim, action_dim)
    prepped = prepare_params(params, action_dim)

    state = jax.random.normal(k_state, (batch, state_dim), jnp.float32)
    # dist.sample() randomness supplied explicitly so the run is deterministic.
    noise = jax.random.normal(k_noise, (batch, action_dim), jnp.float32)

    det, sq, sq_logp, (mean, var) = gaussian_reverse_bc_forward(state, prepped, noise)
    jax.block_until_ready((det, sq, sq_logp, mean, var))

    assert det.shape == (batch, action_dim)
    assert sq.shape == (batch, action_dim)
    assert sq_logp.shape == (batch,)
    assert mean.shape == (batch, action_dim) and var.shape == (batch, action_dim)

    r_det, r_sq, r_logp, r_mean, r_var = _reference(state, params, noise)
    for got, ref in ((det, r_det), (sq, r_sq), (sq_logp, r_logp),
                     (mean, r_mean), (var, r_var)):
        assert jnp.allclose(got, ref, rtol=1e-3, atol=1e-3), (got, ref)

    print("KERNEL_OK")
</pallas_src>

<mosaic_0001>
module attributes {stable_mosaic.version = 11 : i64} {
  func.func @_bc_forward_kernel(%arg0: i32, %arg1: memref<8x16xf32, #tpu.memory_space<vmem>>, %arg2: memref<16x128xf32, #tpu.memory_space<vmem>>, %arg3: memref<1x128xf32, #tpu.memory_space<vmem>>, %arg4: memref<128x128xf32, #tpu.memory_space<vmem>>, %arg5: memref<1x128xf32, #tpu.memory_space<vmem>>, %arg6: memref<128x256xf32, #tpu.memory_space<vmem>>, %arg7: memref<1x256xf32, #tpu.memory_space<vmem>>, %arg8: memref<8x128xf32, #tpu.memory_space<vmem>>, %arg9: memref<8x128xf32, #tpu.memory_space<vmem>>, %arg10: memref<8x128xf32, #tpu.memory_space<vmem>>, %arg11: memref<8x128xf32, #tpu.memory_space<vmem>>, %arg12: memref<8x128xf32, #tpu.memory_space<vmem>>, %arg13: memref<8x128xf32, #tpu.memory_space<vmem>>) attributes {dimension_semantics = [#tpu.dimension_semantics<parallel>], iteration_bounds = array<i64: 1>, scalar_prefetch = 0 : i64, scratch_operands = 0 : i64, tpu.core_type = #tpu.core_type<tc>, window_params = [{transform_indices = @transform_0, window_bounds = array<i64: 8, 16>}, {pipeline_mode = #tpu.pipeline_mode<synchronous>, transform_indices = @transform_1, window_bounds = array<i64: 16, 128>}, {pipeline_mode = #tpu.pipeline_mode<synchronous>, transform_indices = @transform_2, window_bounds = array<i64: 1, 128>}, {pipeline_mode = #tpu.pipeline_mode<synchronous>, transform_indices = @transform_3, window_bounds = array<i64: 128, 128>}, {pipeline_mode = #tpu.pipeline_mode<synchronous>, transform_indices = @transform_4, window_bounds = array<i64: 1, 128>}, {pipeline_mode = #tpu.pipeline_mode<synchronous>, transform_indices = @transform_5, window_bounds = array<i64: 128, 256>}, {pipeline_mode = #tpu.pipeline_mode<synchronous>, transform_indices = @transform_6, window_bounds = array<i64: 1, 256>}, {transform_indices = @transform_7, window_bounds = array<i64: 8, 128>}, {transform_indices = @transform_8, window_bounds = array<i64: 8, 128>}, {transform_indices = @transform_9, window_bounds = array<i64: 8, 128>}, {transform_indices = @transform_10, window_bounds = array<i64: 8, 128>}, {transform_indices = @transform_11, window_bounds = array<i64: 8, 128>}, {transform_indices = @transform_12, window_bounds = array<i64: 8, 128>}]} {
    %c0 = arith.constant 0 : index
    %c0_0 = arith.constant 0 : index
    %0 = vector.load %arg1[%c0, %c0_0] : memref<8x16xf32, #tpu.memory_space<vmem>>, vector<8x16xf32>
    %c0_1 = arith.constant 0 : index
    %c0_2 = arith.constant 0 : index
    %1 = vector.load %arg2[%c0_1, %c0_2] : memref<16x128xf32, #tpu.memory_space<vmem>>, vector<16x128xf32>
    %cst = arith.constant dense<0.000000e+00> : vector<8x128xf32>
    %2 = tpu.matmul %0, %1, %cst {dimension_numbers = #tpu.dot_dimension_numbers<[1], [0], [0], [1], [0, 0, 1, 1], [], []>} : vector<8x16xf32>, vector<16x128xf32>, vector<8x128xf32> -> vector<8x128xf32>
    %c0_3 = arith.constant 0 : index
    %c0_4 = arith.constant 0 : index
    %3 = vector.load %arg3[%c0_3, %c0_4] : memref<1x128xf32, #tpu.memory_space<vmem>>, vector<1x128xf32>
    %4 = vector.broadcast %3 : vector<1x128xf32> to vector<8x128xf32>
    %5 = arith.addf %2, %4 : vector<8x128xf32>
    %cst_5 = arith.constant 0.000000e+00 : f32
    %6 = vector.broadcast %cst_5 : f32 to vector<8x128xf32>
    %7 = arith.maximumf %5, %6 : vector<8x128xf32>
    %c0_6 = arith.constant 0 : index
    %c0_7 = arith.constant 0 : index
    %8 = vector.load %arg4[%c0_6, %c0_7] : memref<128x128xf32, #tpu.memory_space<vmem>>, vector<128x128xf32>
    %cst_8 = arith.constant dense<0.000000e+00> : vector<8x128xf32>
    %9 = tpu.matmul %7, %8, %cst_8 {dimension_numbers = #tpu.dot_dimension_numbers<[1], [0], [0], [1], [0, 0, 1, 1], [], []>} : vector<8x128xf32>, vector<128x128xf32>, vector<8x128xf32> -> vector<8x128xf32>
    %c0_9 = arith.constant 0 : index
    %c0_10 = arith.constant 0 : index
    %10 = vector.load %arg5[%c0_9, %c0_10] : memref<1x128xf32, #tpu.memory_space<vmem>>, vector<1x128xf32>
    %11 = vector.broadcast %10 : vector<1x128xf32> to vector<8x128xf32>
    %12 = arith.addf %9, %11 : vector<8x128xf32>
    %cst_11 = arith.constant 0.000000e+00 : f32
    %13 = vector.broadcast %cst_11 : f32 to vector<8x128xf32>
    %14 = arith.maximumf %12, %13 : vector<8x128xf32>
    %c0_12 = arith.constant 0 : index
    %c0_13 = arith.constant 0 : index
    %15 = vector.load %arg6[%c0_12, %c0_13] : memref<128x256xf32, #tpu.memory_space<vmem>>, vector<128x256xf32>
    %cst_14 = arith.constant dense<0.000000e+00> : vector<8x256xf32>
    %16 = tpu.matmul %14, %15, %cst_14 {dimension_numbers = #tpu.dot_dimension_numbers<[1], [0], [0], [1], [0, 0, 1, 1], [], []>} : vector<8x128xf32>, vector<128x256xf32>, vector<8x256xf32> -> vector<8x256xf32>
    %c0_15 = arith.constant 0 : index
    %c0_16 = arith.constant 0 : index
    %17 = vector.load %arg7[%c0_15, %c0_16] : memref<1x256xf32, #tpu.memory_space<vmem>>, vector<1x256xf32>
    %18 = vector.broadcast %17 : vector<1x256xf32> to vector<8x256xf32>
    %19 = arith.addf %16, %18 : vector<8x256xf32>
    %20 = vector.extract_strided_slice %19 {offsets = [0, 0], sizes = [8, 128], strides = [1, 1]} : vector<8x256xf32> to vector<8x128xf32>
    %21 = vector.extract_strided_slice %19 {offsets = [0, 128], sizes = [8, 128], strides = [1, 1]} : vector<8x256xf32> to vector<8x128xf32>
    %cst_17 = arith.constant -2.000000e+01 : f32
    %cst_18 = arith.constant 2.000000e+00 : f32
    %22 = vector.broadcast %cst_17 : f32 to vector<8x128xf32>
    %23 = arith.maximumf %22, %21 : vector<8x128xf32>
    %24 = vector.broadcast %cst_18 : f32 to vector<8x128xf32>
    %25 = arith.minimumf %24, %23 : vector<8x128xf32>
    %cst_19 = arith.constant 5.000000e-01 : f32
    %26 = vector.broadcast %cst_19 : f32 to vector<8x128xf32>
    %27 = arith.mulf %26, %25 : vector<8x128xf32>
    %28 = math.exp %27 : vector<8x128xf32>
    %29 = arith.mulf %28, %28 : vector<8x128xf32>
    %c0_20 = arith.constant 0 : index
    %c0_21 = arith.constant 0 : index
    %30 = vector.load %arg8[%c0_20, %c0_21] : memref<8x128xf32, #tpu.memory_space<vmem>>, vector<8x128xf32>
    %31 = arith.mulf %28, %30 : vector<8x128xf32>
    %32 = arith.addf %20, %31 : vector<8x128xf32>
    %cst_22 = arith.constant 6.28318548 : f32
    %33 = math.log %cst_22 : f32
    %34 = arith.mulf %30, %30 : vector<8x128xf32>
    %cst_23 = arith.constant dense<0.000000e+00> : vector<8xf32>
    %35 = vector.multi_reduction <add>, %34, %cst_23 [1] : vector<8x128xf32> to vector<8xf32>
    %36 = vector.shape_cast %35 : vector<8xf32> to vector<8x1xf32>
    %cst_24 = arith.constant -5.000000e-01 : f32
    %37 = vector.broadcast %cst_24 : f32 to vector<8x1xf32>
    %38 = arith.mulf %37, %36 : vector<8x1xf32>
    %cst_25 = arith.constant dense<0.000000e+00> : vector<8xf32>
    %39 = vector.multi_reduction <add>, %25, %cst_25 [1] : vector<8x128xf32> to vector<8xf32>
    %40 = vector.shape_cast %39 : vector<8xf32> to vector<8x1xf32>
    %cst_26 = arith.constant 5.000000e-01 : f32
    %41 = vector.broadcast %cst_26 : f32 to vector<8x1xf32>
    %42 = arith.mulf %41, %40 : vector<8x1xf32>
    %43 = arith.subf %38, %42 : vector<8x1xf32>
    %cst_27 = arith.constant 2.000000e+00 : f32
    %44 = arith.mulf %cst_27, %33 : f32
    %45 = vector.broadcast %44 : f32 to vector<8x1xf32>
    %46 = arith.subf %43, %45 : vector<8x1xf32>
    %47 = math.tanh %32 : vector<8x128xf32>
    %48 = arith.mulf %47, %47 : vector<8x128xf32>
    %cst_28 = arith.constant 1.000000e+00 : f32
    %49 = vector.broadcast %cst_28 : f32 to vector<8x128xf32>
    %50 = arith.subf %49, %48 : vector<8x128xf32>
    %cst_29 = arith.constant 9.99999997E-7 : f32
    %51 = vector.broadcast %cst_29 : f32 to vector<8x128xf32>
    %52 = arith.addf %50, %51 : vector<8x128xf32>
    %53 = math.log %52 : vector<8x128xf32>
    %54 = tpu.iota {dimensions = array<i32: 1>} : vector<8x128xi32>
    %c4_i32 = arith.constant 4 : i32
    %55 = vector.broadcast %c4_i32 : i32 to vector<8x128xi32>
    %56 = arith.cmpi slt, %54, %55 : vector<8x128xi32>
    %cst_30 = arith.constant 0.000000e+00 : f32
    %57 = vector.broadcast %cst_30 : f32 to vector<8x128xf32>
    %58 = arith.select %56, %53, %57 : vector<8x128xi1>, vector<8x128xf32>
    %cst_31 = arith.constant dense<0.000000e+00> : vector<8xf32>
    %59 = vector.multi_reduction <add>, %58, %cst_31 [1] : vector<8x128xf32> to vector<8xf32>
    %60 = vector.shape_cast %59 : vector<8xf32> to vector<8x1xf32>
    %61 = arith.subf %46, %60 : vector<8x1xf32>
    %62 = math.tanh %20 : vector<8x128xf32>
    %c0_32 = arith.constant 0 : index
    %c0_33 = arith.constant 0 : index
    %63 = vector.load %arg9[%c0_32, %c0_33] : memref<8x128xf32, #tpu.memory_space<vmem>>, vector<8x128xf32>
    tpu.vector_store %arg9[%c0_32, %c0_33], %62 {strides = array<i32>} : memref<8x128xf32, #tpu.memory_space<vmem>>, vector<8x128xf32>,
    %c0_34 = arith.constant 0 : index
    %c0_35 = arith.constant 0 : index
    %64 = vector.load %arg10[%c0_34, %c0_35] : memref<8x128xf32, #tpu.memory_space<vmem>>, vector<8x128xf32>
    tpu.vector_store %arg10[%c0_34, %c0_35], %47 {strides = array<i32>} : memref<8x128xf32, #tpu.memory_space<vmem>>, vector<8x128xf32>,
    %65 = vector.shape_cast %61 : vector<8x1xf32> to vector<8x1xf32>
    %66 = vector.broadcast %65 : vector<8x1xf32> to vector<8x128xf32>
    %c0_36 = arith.constant 0 : index
    %c0_37 = arith.constant 0 : index
    %67 = vector.load %arg11[%c0_36, %c0_37] : memref<8x128xf32, #tpu.memory_space<vmem>>, vector<8x128xf32>
    tpu.vector_store %arg11[%c0_36, %c0_37], %66 {strides = array<i32>} : memref<8x128xf32, #tpu.memory_space<vmem>>, vector<8x128xf32>,
    %c0_38 = arith.constant 0 : index
    %c0_39 = arith.constant 0 : index
    %68 = vector.load %arg12[%c0_38, %c0_39] : memref<8x128xf32, #tpu.memory_space<vmem>>, vector<8x128xf32>
    tpu.vector_store %arg12[%c0_38, %c0_39], %20 {strides = array<i32>} : memref<8x128xf32, #tpu.memory_space<vmem>>, vector<8x128xf32>,
    %c0_40 = arith.constant 0 : index
    %c0_41 = arith.constant 0 : index
    %69 = vector.load %arg13[%c0_40, %c0_41] : memref<8x128xf32, #tpu.memory_space<vmem>>, vector<8x128xf32>
    tpu.vector_store %arg13[%c0_40, %c0_41], %29 {strides = array<i32>} : memref<8x128xf32, #tpu.memory_space<vmem>>, vector<8x128xf32>,
    return
  }
  func.func @transform_0(%arg0: i32) -> (i32, i32) {
    %c0_i32 = arith.constant 0 : i32
    %c0_i32_0 = arith.constant 0 : i32
    return %arg0, %c0_i32 : i32, i32
  }
  func.func @transform_1(%arg0: i32) -> (i32, i32) {
    %c0_i32 = arith.constant 0 : i32
    %c0_i32_0 = arith.constant 0 : i32
    %c0_i32_1 = arith.constant 0 : i32
    return %c0_i32, %c0_i32_0 : i32, i32
  }
  func.func @transform_2(%arg0: i32) -> (i32, i32) {
    %c0_i32 = arith.constant 0 : i32
    %c0_i32_0 = arith.constant 0 : i32
    %c0_i32_1 = arith.constant 0 : i32
    return %c0_i32, %c0_i32_0 : i32, i32
  }
  func.func @transform_3(%arg0: i32) -> (i32, i32) {
    %c0_i32 = arith.constant 0 : i32
    %c0_i32_0 = arith.constant 0 : i32
    %c0_i32_1 = arith.constant 0 : i32
    return %c0_i32, %c0_i32_0 : i32, i32
  }
  func.func @transform_4(%arg0: i32) -> (i32, i32) {
    %c0_i32 = arith.constant 0 : i32
    %c0_i32_0 = arith.constant 0 : i32
    %c0_i32_1 = arith.constant 0 : i32
    return %c0_i32, %c0_i32_0 : i32, i32
  }
  func.func @transform_5(%arg0: i32) -> (i32, i32) {
    %c0_i32 = arith.constant 0 : i32
    %c0_i32_0 = arith.constant 0 : i32
    %c0_i32_1 = arith.constant 0 : i32
    return %c0_i32, %c0_i32_0 : i32, i32
  }
  func.func @transform_6(%arg0: i32) -> (i32, i32) {
    %c0_i32 = arith.constant 0 : i32
    %c0_i32_0 = arith.constant 0 : i32
    %c0_i32_1 = arith.constant 0 : i32
    return %c0_i32, %c0_i32_0 : i32, i32
  }
  func.func @transform_7(%arg0: i32) -> (i32, i32) {
    %c0_i32 = arith.constant 0 : i32
    %c0_i32_0 = arith.constant 0 : i32
    return %arg0, %c0_i32 : i32, i32
  }
  func.func @transform_8(%arg0: i32) -> (i32, i32) {
    %c0_i32 = arith.constant 0 : i32
    %c0_i32_0 = arith.constant 0 : i32
    return %arg0, %c0_i32 : i32, i32
  }
  func.func @transform_9(%arg0: i32) -> (i32, i32) {
    %c0_i32 = arith.constant 0 : i32
    %c0_i32_0 = arith.constant 0 : i32
    return %arg0, %c0_i32 : i32, i32
  }
  func.func @transform_10(%arg0: i32) -> (i32, i32) {
    %c0_i32 = arith.constant 0 : i32
    %c0_i32_0 = arith.constant 0 : i32
    return %arg0, %c0_i32 : i32, i32
  }
  func.func @transform_11(%arg0: i32) -> (i32, i32) {
    %c0_i32 = arith.constant 0 : i32
    %c0_i32_0 = arith.constant 0 : i32
    return %arg0, %c0_i32 : i32, i32
  }
  func.func @transform_12(%arg0: i32) -> (i32, i32) {
    %c0_i32 = arith.constant 0 : i32
    %c0_i32_0 = arith.constant 0 : i32
    return %arg0, %c0_i32 : i32, i32
  }
}

</mosaic_0001>

<bundles_post_ra>
// kernel: tpu_custom_call.1
= control target key start
LH: loop header
LB: loop body
LE: loop exit
PB: predicated region body
PF: predicated region fallthrough
CT: control target
= control target key end

     0   :  { %18 = vsyncpa [#allocation3], 0  ;;  %s1058_s0 = inlined_call_operand.hbm [shape: f32[8,16], index: 0, kind: input, shape index: {}]   ;;  %s1059_s1 = inlined_call_operand.hbm [shape: f32[16,128], index: 1, kind: input, shape index: {}]   ;;  %s1060_s2 = inlined_call_operand.vmem [shape: f32[1,128], index: 2, kind: input, shape index: {}]   ;;  %s1061_s3 = inlined_call_operand.hbm [shape: f32[128,128], index: 3, kind: input, shape index: {}]   ;;  %s1062_s4 = inlined_call_operand.vmem [shape: f32[1,128], index: 4, kind: input, shape index: {}]   ;;  %s1063_s5 = inlined_call_operand.hbm [shape: f32[128,256], index: 5, kind: input, shape index: {}]   ;;  %s1064_s6 = inlined_call_operand.vmem [shape: f32[1,256], index: 6, kind: input, shape index: {}]   ;;  %s1065_s7 = inlined_call_operand.vmem [shape: f32[8,128], index: 7, kind: input, shape index: {}]   ;;  %s1066_s8 = inlined_call_operand.hbm [shape: f32[8,128], index: 8, kind: output, shape index: {0}]   ;;  %s1067_s9 = inlined_call_operand.hbm [shape: f32[8,128], index: 9, kind: output, shape index: {1}]   ;;  %s1068_s10 = inlined_call_operand.hbm [shape: f32[8,128], index: 10, kind: output, shape index: {2}]   ;;  %s1069_s11 = inlined_call_operand.hbm [shape: f32[8,128], index: 11, kind: output, shape index: {3}]   ;;  %s1070_s12 = inlined_call_operand.hbm [shape: f32[8,128], index: 12, kind: output, shape index: {4}]  }
   0x1   :  { %19 = vsyncpa [#allocation6], 0 }
   0x2   :  { %20 = vsyncpa [#allocation9], 0 }
   0x3   :  { %21 = vsyncpa [#allocation4], 0 }
   0x4   :  { %22 = vsyncpa [#allocation12], 0 }
   0x5   :  { %23 = vsyncpa [#allocation15], 0  ;;  %s851_s21 = smov [#allocation5]   ;;  %s641_s25 = scalar_lea.hbm %s1059_s1, 256 }
   0x6   :  { %s39_s22 = sshll.u32 %s851_s21, 4  ;;  %p642_p0 = scmp.ne.s32.totalorder %s1059_s1, %s641_s25  ;;  %s40_s22 = int_to_ptr.vmem [resolvable:$true] %s39_s22 }
   0x7   :  { %p645_p1 = scmp.lt.u32.totalorder %s641_s25, %s1059_s1 }
   0x9   :  { %p647_p2 = pnand %p645_p1, %p642_p0 }
   0xb   :  { %650 = shalt.err (!%p647_p2)
}
   0xc   :  { %s651_s30 = scalar_lea.vmem %s40_s22, 256  ;;  %p656_p4 = scmp.lt.s32.totalorder %s40_s22, %s40_s22 }
   0xd   :  { %p652_p3 = scmp.ne.s32.totalorder %s40_s22, %s651_s30  ;;  %p657_p5 = scmp.lt.s32.totalorder %s651_s30, %s651_s30 }
   0xf   :  { %p658_p6 = por %p657_p5, %p656_p4 }
  0x11   :  { %p659_p7 = pnand %p658_p6, %p652_p3 }
  0x13   :  { %662 = shalt.err (!%p659_p7)
}
  0x14   :  { %s852_s13 = smov 128   ;;  %s853_s14 = smov 8  }
  0x15   :  { %45 = dma.hbm_to_vmem [thread:$0]  %s1059_s1, 256, %s40_s22, [#allocation6], %s852_s13, %s852_s13, %s853_s14  }
  0x16   :  { %s854_s17 = smov [#allocation2]   ;;  %s855_s19 = smov [#allocation7]  }
  0x17   :  { %s30_s18 = sshll.u32 %s854_s17, 4  ;;  %s53_s20 = sshll.u32 %s855_s19, 4  ;;  %s31_s18 = int_to_ptr.vmem [resolvable:$true] %s30_s18  ;;  %s54_s20 = int_to_ptr.vmem [resolvable:$true] %s53_s20 }
  0x18   :  { %s663_s24 = scalar_lea.hbm %s1058_s0, 128 }
  0x19   :  { %p664_p8 = scmp.ne.s32.totalorder %s1058_s0, %s663_s24  ;;  %p667_p9 = scmp.lt.u32.totalorder %s663_s24, %s1058_s0 }
  0x1b   :  { %p669_p10 = pnand %p667_p9, %p664_p8 }
  0x1d   :  { %672 = shalt.err (!%p669_p10)
}
  0x1e   :  { %s673_s1 = scalar_lea.vmem %s31_s18, 128  ;;  %p678_p12 = scmp.lt.s32.totalorder %s31_s18, %s31_s18 }
  0x1f   :  { %p674_p11 = scmp.ne.s32.totalorder %s31_s18, %s673_s1  ;;  %p679_p13 = scmp.lt.s32.totalorder %s673_s1, %s673_s1 }
  0x21   :  { %p680_p0 = por %p679_p13, %p678_p12 }
  0x23   :  { %p681_p1 = pnand %p680_p0, %p674_p11 }
  0x25   :  { %684 = shalt.err (!%p681_p1)
}
  0x26   :  { %33 = dma.hbm_to_vmem [thread:$0]  %s1058_s0, 128, %s31_s18, [#allocation3]  }
  0x27   :  { %s685_s16 = scalar_lea.hbm %s1061_s3, 2048 }
  0x28   :  { %p686_p2 = scmp.ne.s32.totalorder %s1061_s3, %s685_s16  ;;  %p689_p3 = scmp.lt.u32.totalorder %s685_s16, %s1061_s3 }
  0x2a   :  { %p691_p4 = pnand %p689_p3, %p686_p2 }
  0x2c   :  { %694 = shalt.err (!%p691_p4)
}
  0x2d   :  { %s695_s24 = scalar_lea.vmem %s54_s20, 2048  ;;  %p700_p6 = scmp.lt.s32.totalorder %s54_s20, %s54_s20 }
  0x2e   :  { %p696_p5 = scmp.ne.s32.totalorder %s54_s20, %s695_s24  ;;  %p701_p7 = scmp.lt.s32.totalorder %s695_s24, %s695_s24 }
  0x30   :  { %p702_p8 = por %p701_p7, %p700_p6 }
  0x32   :  { %p703_p9 = pnand %p702_p8, %p696_p5 }
  0x34   :  { %706 = shalt.err (!%p703_p9)
}
  0x35   :  { %59 = dma.hbm_to_vmem [thread:$0]  %s1061_s3, 2048, %s54_s20, [#allocation6], %s852_s13, %s852_s13, %s853_s14  }
  0x36   :  { %s856_s25 = smov [#allocation8]   ;;  %s707_s1 = scalar_lea.hbm %s1063_s5, 4096 }
  0x37   :  { %s67_s26 = sshll.u32 %s856_s25, 4  ;;  %p708_p10 = scmp.ne.s32.totalorder %s1063_s5, %s707_s1  ;;  %s68_s26 = int_to_ptr.vmem [resolvable:$true] %s67_s26 }
  0x38   :  { %p711_p11 = scmp.lt.u32.totalorder %s707_s1, %s1063_s5 }
  0x3a   :  { %p713_p12 = pnand %p711_p11, %p708_p10 }
  0x3c   :  { %716 = shalt.err (!%p713_p12)
}
  0x3d   :  { %s717_s16 = scalar_lea.vmem %s68_s26, 4096  ;;  %p722_p0 = scmp.lt.s32.totalorder %s68_s26, %s68_s26 }
  0x3e   :  { %p718_p13 = scmp.ne.s32.totalorder %s68_s26, %s717_s16  ;;  %p723_p1 = scmp.lt.s32.totalorder %s717_s16, %s717_s16 }
  0x40   :  { %p724_p2 = por %p723_p1, %p722_p0 }
  0x42   :  { %p725_p3 = pnand %p724_p2, %p718_p13 }
  0x44   :  { %728 = shalt.err (!%p725_p3)
}
  0x45   :  { %s857_s3 = smov 256   ;;  %s858_s13 = smov 16  }
  0x46   :  { %73 = dma.hbm_to_vmem [thread:$0]  %s1063_s5, 4096, %s68_s26, [#allocation9], %s857_s3, %s857_s3, %s858_s13  }
  0x47   :  { %839 = dma.done.wait [#allocation3], 128  }
  0x48   :  { %840 = vsyncadd [#allocation3], 4294967168 }
  0x49   :  { %841 = dma.done.wait [#allocation6], 2304  }
  0x4a   :  { %842 = vsyncadd [#allocation6], 4294964992 }
  0x4b   :  { %843 = dma.done.wait [#allocation9], 4096  }
  0x4c   :  { %844 = vsyncadd [#allocation9], 4294963200  ;;  %v859_v0 = vmov 0.0|0.0   ;;  %vm860_vm0 = vmmov 0   ;;  %v861_v1 = vmov 0.0   ;;  %v91_v2 = vld [vmem:[#allocation5] sm:$0xff] }
  0x4d   :  { %558 = vmatprep.subr.bf16.mxu0 %v859_v0  ;;  %520 = vmatprep.mubr.msk.f32.mxu0 %vm860_vm0, %v861_v1  ;;  %v92_v3 = vld [vmem:[#allocation5 + $0x8] sm:$0xff]  ;;  %v175_v5 = vld [vmem:[#allocation7] sm:$0xff]  ;;  %v176_v6 = vld [vmem:[#allocation7 + $0x8] sm:$0xff]  ;;  %vm100_vm1 = vcmask 130048  }
  0x4e   :  { %561 = vmatprep.subr.bf16.mxu1 %v859_v0  ;;  %555 = vmatprep.mubr.msk.f32.mxu1 %vm860_vm0, %v861_v1  ;;  %v559_v4 = vpack.c.bf16 %v92_v3, %v91_v2  ;;  %v177_v7 = vld [vmem:[#allocation7 + $0x10] sm:$0xff]  ;;  %v562_v8 = vpack.c.bf16 %v176_v6, %v175_v5  ;;  %v178_v9 = vld [vmem:[#allocation7 + $0x18] sm:$0xff]  ;;  %v90_v10 = vld [vmem:[#allocation2] sm:$0xff] }
  0x4f   :  { %v565_v11 = vpack.c.bf16 %v178_v9, %v177_v7  ;;  %v179_v12 = vld [vmem:[#allocation7 + $0x20] sm:$0xff]  ;;  %v180_v13 = vld [vmem:[#allocation7 + $0x28] sm:$0xff]  ;;  %v181_v15 = vld [vmem:[#allocation7 + $0x30] sm:$0xff] }
  0x50   :  { %560 = vmatpush3.bf16.msra.mxu0 %v559_v4  ;;  %563 = vmatpush3.bf16.msra.mxu1 %v562_v8  ;;  %v568_v14 = vpack.c.bf16 %v180_v13, %v179_v12  ;;  %v182_v16 = vld [vmem:[#allocation7 + $0x38] sm:$0xff]  ;;  %v183_v18 = vld [vmem:[#allocation7 + $0x40] sm:$0xff]  ;;  %v184_v19 = vld [vmem:[#allocation7 + $0x48] sm:$0xff] }
  0x51   :  { %564 = vmatprep.subr.bf16.mxu1 %v859_v0  ;;  %v571_v17 = vpack.c.bf16 %v182_v16, %v181_v15  ;;  %v574_v20 = vpack.c.bf16 %v184_v19, %v183_v18  ;;  %v185_v21 = vld [vmem:[#allocation7 + $0x50] sm:$0xff]  ;;  %v186_v22 = vld [vmem:[#allocation7 + $0x58] sm:$0xff]  ;;  %v187_v24 = vld [vmem:[#allocation7 + $0x60] sm:$0xff] }
  0x52   :  { %v577_v23 = vpack.c.bf16 %v186_v22, %v185_v21  ;;  %v188_v25 = vld [vmem:[#allocation7 + $0x68] sm:$0xff]  ;;  %v189_v27 = vld [vmem:[#allocation7 + $0x70] sm:$0xff]  ;;  %v190_v28 = vld [vmem:[#allocation7 + $0x78] sm:$0xff] }
  0x53   :  { %521 = vmatmul.mubr.msk.f32.vlgmr.msra.gmra.mrb[0].mxu0 %vm100_vm1, %v90_v10  ;;  %v580_v26 = vpack.c.bf16 %v188_v25, %v187_v24  ;;  %v583_v29 = vpack.c.bf16 %v190_v28, %v189_v27  ;;  %v270_v30 = vld [vmem:[#allocation8 + $0x8] sm:$0xff]  ;;  %v272_v31 = vld [vmem:[#allocation8 + $0x18] sm:$0xff]  ;;  %v269_v32 = vld [vmem:[#allocation8] sm:$0xff] }
  0x54   :  { %377 = vmatprep.mubr.f32.mxu0 %v861_v1  ;;  %566 = vmatpush3.bf16.msra.mxu1 %v565_v11  ;;  %v585_v33 = vpack.c.bf16 %v272_v31, %v270_v30  ;;  %v271_v34 = vld [vmem:[#allocation8 + $0x10] sm:$0xff]  ;;  %v274_v35 = vld [vmem:[#allocation8 + $0x28] sm:$0xff]  ;;  %v276_v36 = vld [vmem:[#allocation8 + $0x38] sm:$0xff] }
  0x55   :  { %567 = vmatprep.subr.bf16.mxu1 %v859_v0  ;;  %v587_v37 = vpack.c.bf16 %v271_v34, %v269_v32  ;;  %v589_v38 = vpack.c.bf16 %v276_v36, %v274_v35  ;;  %v273_v39 = vld [vmem:[#allocation8 + $0x20] sm:$0xff]  ;;  %v275_v40 = vld [vmem:[#allocation8 + $0x30] sm:$0xff]  ;;  %v278_v41 = vld [vmem:[#allocation8 + $0x48] sm:$0xff] }
  0x56   :  { %586 = vmatprep.subr.bf16.mxu0 %v585_v33  ;;  %v280_v42 = vld [vmem:[#allocation8 + $0x58] sm:$0xff]  ;;  %v591_v43 = vpack.c.bf16 %v275_v40, %v273_v39  ;;  %v277_v45 = vld [vmem:[#allocation8 + $0x40] sm:$0xff]  ;;  %v279_v46 = vld [vmem:[#allocation8 + $0x50] sm:$0xff] }
  0x57   :  { %588 = vmatpush1.bf16.msra.mxu0 %v587_v37  ;;  %v593_v44 = vpack.c.bf16 %v280_v42, %v278_v41  ;;  %v282_v47 = vld [vmem:[#allocation8 + $0x68] sm:$0xff]  ;;  %v284_v48 = vld [vmem:[#allocation8 + $0x78] sm:$0xff]  ;;  %v595_v49 = vpack.c.bf16 %v279_v46, %v277_v45  ;;  %v281_v51 = vld [vmem:[#allocation8 + $0x60] sm:$0xff] }
  0x58   :  { %569 = vmatpush3.bf16.msra.mxu1 %v568_v14  ;;  %590 = vmatprep.subr.bf16.mxu0 %v589_v38  ;;  %v597_v50 = vpack.c.bf16 %v284_v48, %v282_v47  ;;  %v283_v52 = vld [vmem:[#allocation8 + $0x70] sm:$0xff]  ;;  %v286_v53 = vld [vmem:[#allocation8 + $0x88] sm:$0xff]  ;;  %v288_v54 = vld [vmem:[#allocation8 + $0x98] sm:$0xff] }
  0x59   :  { %570 = vmatprep.subr.bf16.mxu1 %v859_v0  ;;  %v599_v55 = vpack.c.bf16 %v283_v52, %v281_v51  ;;  %v601_v56 = vpack.c.bf16 %v288_v54, %v286_v53  ;;  %v285_v57 = vld [vmem:[#allocation8 + $0x80] sm:$0xff]  ;;  %v287_v58 = vld [vmem:[#allocation8 + $0x90] sm:$0xff]  ;;  %v290_v59 = vld [vmem:[#allocation8 + $0xa8] sm:$0xff] }
  0x5a   :  { %v292_v60 = vld [vmem:[#allocation8 + $0xb8] sm:$0xff]  ;;  %v603_v61 = vpack.c.bf16 %v287_v58, %v285_v57  ;;  %v289_v63 = vld [vmem:[#allocation8 + $0xa0] sm:$0xff]  ;;  %v294_v1 = vld [vmem:[#allocation8 + $0xc8] sm:$0xff] }
  0x5b   :  { %592 = vmatpush1.bf16.msra.mxu0 %v591_v43  ;;  %v605_v62 = vpack.c.bf16 %v292_v60, %v290_v59  ;;  %v296_v2 = vld [vmem:[#allocation8 + $0xd8] sm:$0xff]  ;;  %v293_v5 = vld [vmem:[#allocation8 + $0xc0] sm:$0xff]  ;;  %v295_v6 = vld [vmem:[#allocation8 + $0xd0] sm:$0xff] }
  0x5c   :  { %572 = vmatpush3.bf16.msra.mxu1 %v571_v17  ;;  %594 = vmatprep.subr.bf16.mxu0 %v593_v44  ;;  %v609_v4 = vpack.c.bf16 %v296_v2, %v294_v1  ;;  %v611_v7 = vpack.c.bf16 %v295_v6, %v293_v5  ;;  %v492_v8 = vld [vmem:[%s1060_s2] ss:$0 sm:$0xff]  ;;  %v300_v14 = vld [vmem:[#allocation8 + $0xf8] sm:$0xff]  ;;  %v297_v16 = vld [vmem:[#allocation8 + $0xe0] sm:$0xff] }
  0x5d   :  { %573 = vmatprep.subr.bf16.mxu1 %v859_v0  ;;  %v298_v13 = vld [vmem:[#allocation8 + $0xe8] sm:$0xff]  ;;  %v299_v17 = vld [vmem:[#allocation8 + $0xf0] sm:$0xff] }
  0x5e   :  { %v613_v15 = vpack.c.bf16 %v300_v14, %v298_v13  ;;  %v615_v18 = vpack.c.bf16 %v299_v17, %v297_v16  ;;  %v494_v19 = vld [vmem:[%s1062_s4] ss:$0 sm:$0xff]  ;;  %s862_s4 = smov [#allocation11]  }
  0x5f   :  { %596 = vmatpush1.bf16.msra.mxu0 %v595_v49  ;;  %v390_v24 = vld [vmem:[%s1065_s7] sm:$0xff]  ;;  %s863_s7 = smov [#allocation14]  }
  0x60   :  { %575 = vmatpush3.bf16.msra.mxu1 %v574_v20  ;;  %598 = vmatprep.subr.bf16.mxu0 %v597_v50  ;;  %v393_v25 = vmul.f32 %v390_v24, %v390_v24  ;;  %s457_s18 = sshll.u32 %s863_s7, 4  ;;  %s458_s18 = int_to_ptr.vmem [resolvable:$true] %s457_s18 }
  0x61   :  { %576 = vmatprep.subr.bf16.mxu1 %v859_v0 }
  0x62   :  { %394 = vadd.xlane.f32.xlu0 %v393_v25 }
  0x63   :  { %600 = vmatpush1.bf16.msra.mxu0 %v599_v55 }
  0x64   :  { %578 = vmatpush3.bf16.msra.mxu1 %v577_v23  ;;  %602 = vmatprep.subr.bf16.mxu0 %v601_v56 }
  0x65   :  { %579 = vmatprep.subr.bf16.mxu1 %v859_v0 }
  0x67   :  { %604 = vmatpush1.bf16.msra.mxu0 %v603_v61 }
  0x68   :  { %581 = vmatpush3.bf16.msra.mxu1 %v580_v26  ;;  %606 = vmatprep.subr.bf16.mxu0 %v605_v62  ;;  %v303_v26 = vlaneseq }
  0x69   :  { %582 = vmatprep.subr.bf16.mxu1 %v859_v0  ;;  %v291_v0 = vld [vmem:[#allocation8 + $0xb0] sm:$0xff] }
  0x6a   :  { %v607_v3 = vpack.c.bf16 %v291_v0, %v289_v63  ;;  %v304_v27 = vshrl.u32 %v303_v26, 7  ;;  %v409_v50 = vand.u32 127, %v303_v26 }
  0x6c   :  { %584 = vmatpush3.bf16.msra.mxu1 %v583_v29  ;;  %608 = vmatpush1.bf16.msra.mxu0 %v607_v3  ;;  %v305_v28 = vsub.s32 0, %v304_v27  ;;  %v301_v29 = vld [vmem:[%s1064_s6] sm:$0x3]  ;;  %v309_v30 = vsub.s32 1, %v304_v27  ;;  %vm410_vm2 = vcmp.lt.s32.totalorder %v409_v50, 4  ;;  %s437_s6 = sshll.u32 %s862_s4, 4  ;;  %s438_s6 = int_to_ptr.vmem [resolvable:$true] %s437_s6 }
  0x6d   :  { %610 = vmatprep.subr.bf16.mxu0 %v609_v4  ;;  %s729_s25 = scalar_lea.vmem %s438_s6, 128  ;;  %p734_p5 = scmp.lt.s32.totalorder %s438_s6, %s438_s6 }
  0x6e   :  { %v306_v31 = vrot.slane %v301_v29, %v305_v28  ;;  %v310_v32 = vrot.slane %v301_v29, %v309_v30  ;;  %p730_p4 = scmp.ne.s32.totalorder %s438_s6, %s729_s25  ;;  %p735_p6 = scmp.lt.s32.totalorder %s729_s25, %s729_s25 }
  0x70   :  { %612 = vmatpush1.bf16.msra.mxu0 %v611_v7  ;;  %p736_p7 = por %p735_p6, %p734_p5 }
  0x71   :  { %614 = vmatprep.subr.bf16.mxu0 %v613_v15 }
  0x72   :  { %p737_p8 = pnand %p736_p7, %p730_p4 }
  0x74   :  { %616 = vmatpush1.bf16.msra.mxu0 %v615_v18 }
 0x126   :  { %v170_v9 = vpop.f32.mrb[0].mxu0 }
 0x127   :  { %v171_v10 = vadd.f32 %v492_v8, %v170_v9  ;;  %v522_v11 = vpop.f32.mrb[1].mxu0 }
 0x129   :  { %v174_v12 = vmax.f32 %v171_v10, 0.0 }
 0x12b   :  { %556 = vmatmul.mubr.f32.vlgmr.msra.gmra.mrb[0].mxu1 %v174_v12 }
 0x1fe   :  { %v264_v20 = vpop.f32.mrb[0].mxu1 }
 0x1ff   :  { %v265_v21 = vadd.f32 %v494_v19, %v264_v20  ;;  %v557_v22 = vpop.f32.mrb[1].mxu1 }
 0x201   :  { %v268_v23 = vmax.f32 %v265_v21, 0.0 }
 0x203   :  { %378 = vmatmul.mubr.f32.vlgmr.msra.gmra.mrb[2].mxu0 %v268_v23 }
 0x2d6   :  { %v379_v33 = vpop.f32.mrb[2].mxu0 }
 0x2d7   :  { %v380_v34 = vadd.f32 %v379_v33, %v306_v31  ;;  %v381_v35 = vpop.f32.mrb[3].mxu0 }
 0x2d8   :  { %v382_v36 = vadd.f32 %v381_v35, %v310_v32 }
 0x2d9   :  { %633 = vtanh.f32 %v380_v34  ;;  %419 = vst [vmem:[#allocation14] sm:$0xff] %v380_v34 }
 0x2da   :  { %v384_v37 = vmax.f32 %v382_v36, -20.0 }
 0x2dc   :  { %v385_v38 = vmin.f32 %v384_v37, 2.0 }
 0x2de   :  { %397 = vadd.xlane.f32.xlu0 %v385_v38  ;;  %v386_v39 = vmul.f32 0.5, %v385_v38 }
 0x2e0   :  { %v387_v40 = vmul.f32 1.442695, %v386_v39 }
 0x2e2   :  { %635 = vpow2.f32 %v387_v40 }
 0x2e3   :  { %v634_v41 = vpop.eup %633 }
 0x2e4   :  { %416 = vst [vmem:[#allocation10] sm:$0xff] %v634_v41 }
 0x2ec   :  { %v636_v42 = vpop.eup %635 }
 0x2ed   :  { %v391_v43 = vmul.f32 %v636_v42, %v390_v24  ;;  %v389_v44 = vmul.f32 %v636_v42, %v636_v42 }
 0x2ef   :  { %v392_v45 = vadd.f32 %v391_v43, %v380_v34  ;;  %420 = vst [vmem:[#allocation16] sm:$0xff] %v389_v44 }
 0x2f1   :  { %637 = vtanh.f32 %v392_v45 }
 0x2fb   :  { %v638_v46 = vpop.eup %637 }
 0x2fc   :  { %v403_v47 = vmul.f32 %v638_v46, %v638_v46  ;;  %417 = vst [vmem:[#allocation11] sm:$0xff] %v638_v46 }
 0x2fe   :  { %v404_v48 = vsub.f32 1.0, %v403_v47 }
 0x300   :  { %v405_v49 = vadd.f32 1e-06, %v404_v48 }
 0x302   :  { %639 = vlog2.f32 %v405_v49 }
 0x30c   :  { %v640_v51 = vpop.eup %639 }
 0x30d   :  { %v407_v52 = vmul.f32 0.6931472, %v640_v51 }
 0x30f   :  { %v411_v53 = vsel %vm410_vm2, %v407_v52, 0.0 }
 0x310   :  { %412 = vadd.xlane.f32.xlu1 %v411_v53 }
 0x311   :  { %740 = shalt.err (!%p737_p8)
}
 0x312   :  { %s741_s28 = scalar_lea.hbm %s1067_s9, 128 }
 0x313   :  { %p742_p9 = scmp.ne.s32.totalorder %s1067_s9, %s741_s28  ;;  %p745_p10 = scmp.lt.u32.totalorder %s741_s28, %s1067_s9 }
 0x315   :  { %p747_p11 = pnand %p745_p10, %p742_p9 }
 0x317   :  { %750 = shalt.err (!%p747_p11)
}
 0x318   :  { %440 = dma.vmem_to_hbm [thread:$0]  %s438_s6, 128, %s1067_s9, [#allocation12]  }
 0x319   :  { %s751_s3 = scalar_lea.vmem %s458_s18, 128  ;;  %p756_p13 = scmp.lt.s32.totalorder %s458_s18, %s458_s18 }
 0x31a   :  { %p752_p12 = scmp.ne.s32.totalorder %s458_s18, %s751_s3  ;;  %p757_p0 = scmp.lt.s32.totalorder %s751_s3, %s751_s3 }
 0x31c   :  { %p758_p1 = por %p757_p0, %p756_p13 }
 0x31e   :  { %p759_p2 = pnand %p758_p1, %p752_p12 }
 0x320   :  { %762 = shalt.err (!%p759_p2)
}
 0x321   :  { %s763_s20 = scalar_lea.hbm %s1069_s11, 128 }
 0x322   :  { %p764_p3 = scmp.ne.s32.totalorder %s1069_s11, %s763_s20  ;;  %p767_p4 = scmp.lt.u32.totalorder %s763_s20, %s1069_s11 }
 0x324   :  { %p769_p5 = pnand %p767_p4, %p764_p3 }
 0x326   :  { %772 = shalt.err (!%p769_p5)
}
 0x327   :  { %460 = dma.vmem_to_hbm [thread:$0]  %s458_s18, 128, %s1069_s11, [#allocation15]  }
 0x328   :  { %s864_s23 = smov [#allocation10]  }
 0x329   :  { %s427_s24 = sshll.u32 %s864_s23, 4  ;;  %s428_s24 = int_to_ptr.vmem [resolvable:$true] %s427_s24 }
 0x32a   :  { %s773_s0 = scalar_lea.vmem %s428_s24, 128  ;;  %p778_p7 = scmp.lt.s32.totalorder %s428_s24, %s428_s24 }
 0x32b   :  { %p774_p6 = scmp.ne.s32.totalorder %s428_s24, %s773_s0  ;;  %p779_p8 = scmp.lt.s32.totalorder %s773_s0, %s773_s0 }
 0x32d   :  { %p780_p9 = por %p779_p8, %p778_p7 }
 0x32f   :  { %p781_p10 = pnand %p780_p9, %p774_p6 }
 0x331   :  { %784 = shalt.err (!%p781_p10)
}
 0x332   :  { %s785_s7 = scalar_lea.hbm %s1066_s8, 128 }
 0x333   :  { %p786_p11 = scmp.ne.s32.totalorder %s1066_s8, %s785_s7  ;;  %p789_p12 = scmp.lt.u32.totalorder %s785_s7, %s1066_s8 }
 0x335   :  { %p791_p13 = pnand %p789_p12, %p786_p11 }
 0x337   :  { %794 = shalt.err (!%p791_p13)
}
 0x338   :  { %430 = dma.vmem_to_hbm [thread:$0]  %s428_s24, 128, %s1066_s8, [#allocation4]  }
 0x339   :  { %s865_s1 = smov [#allocation16]  }
 0x33a   :  { %s467_s22 = sshll.u32 %s865_s1, 4  ;;  %s468_s22 = int_to_ptr.vmem [resolvable:$true] %s467_s22 }
 0x33b   :  { %s795_s29 = scalar_lea.vmem %s468_s22, 128  ;;  %p800_p1 = scmp.lt.s32.totalorder %s468_s22, %s468_s22 }
 0x33c   :  { %p796_p0 = scmp.ne.s32.totalorder %s468_s22, %s795_s29  ;;  %p801_p2 = scmp.lt.s32.totalorder %s795_s29, %s795_s29 }
 0x33e   :  { %p802_p3 = por %p801_p2, %p800_p1 }
 0x340   :  { %p803_p4 = pnand %p802_p3, %p796_p0 }
 0x342   :  { %806 = shalt.err (!%p803_p4)
}
 0x343   :  { %s807_s16 = scalar_lea.hbm %s1070_s12, 128 }
 0x344   :  { %p808_p5 = scmp.ne.s32.totalorder %s1070_s12, %s807_s16  ;;  %p811_p6 = scmp.lt.u32.totalorder %s807_s16, %s1070_s12 }
 0x346   :  { %p813_p7 = pnand %p811_p6, %p808_p5 }
 0x348   :  { %816 = shalt.err (!%p813_p7)
}
 0x349   :  { %470 = dma.vmem_to_hbm [thread:$0]  %s468_s22, 128, %s1070_s12, [#allocation15]   ;;  %v395_v54 = vpop.xlane.xlu0 %394 }
 0x34a   :  { %v396_v56 = vmul.f32 -0.5, %v395_v54  ;;  %s866_s17 = smov [#allocation13]  }
 0x34b   :  { %s447_s19 = sshll.u32 %s866_s17, 4  ;;  %s448_s19 = int_to_ptr.vmem [resolvable:$true] %s447_s19 }
 0x34c   :  { %s817_s21 = scalar_lea.vmem %s448_s19, 128  ;;  %p822_p9 = scmp.lt.s32.totalorder %s448_s19, %s448_s19 }
 0x34d   :  { %p818_p8 = scmp.ne.s32.totalorder %s448_s19, %s817_s21  ;;  %p823_p10 = scmp.lt.s32.totalorder %s817_s21, %s817_s21 }
 0x34f   :  { %p824_p11 = por %p823_p10, %p822_p9 }
 0x351   :  { %p825_p12 = pnand %p824_p11, %p818_p8 }
 0x36b   :  { %v398_v55 = vpop.xlane.xlu0 %397 }
 0x36c   :  { %v399_v57 = vmul.f32 0.5, %v398_v55 }
 0x36e   :  { %v400_v58 = vsub.f32 %v396_v56, %v399_v57 }
 0x370   :  { %v495_v59 = vadd.f32 -3.675754, %v400_v58 }
 0x39d   :  { %v413_v60 = vpop.xlane.xlu1 %412 }
 0x39e   :  { %v414_v61 = vsub.f32 %v495_v59, %v413_v60 }
 0x3a0   :  { %418 = vst [vmem:[#allocation13] sm:$0xff] %v414_v61 }
 0x3a1   :  { %828 = shalt.err (!%p825_p12)
}
 0x3a2   :  { %s829_s2 = scalar_lea.hbm %s1068_s10, 128 }
 0x3a3   :  { %p830_p13 = scmp.ne.s32.totalorder %s1068_s10, %s829_s2  ;;  %p833_p0 = scmp.lt.u32.totalorder %s829_s2, %s1068_s10 }
 0x3a5   :  { %p835_p1 = pnand %p833_p0, %p830_p13 }
 0x3a7   :  { %838 = shalt.err (!%p835_p1)
}
 0x3a8   :  { %450 = dma.vmem_to_hbm [thread:$0]  %s448_s19, 128, %s1068_s10, [#allocation12]  }
 0x3a9   :  { %845 = dma.done.wait [#allocation4], 128  }
 0x3aa   :  { %846 = vsyncadd [#allocation4], 4294967168 }
 0x3ab   :  { %847 = dma.done.wait [#allocation12], 256  }
 0x3ac   :  { %848 = vsyncadd [#allocation12], 4294967040 }
 0x3ad   :  { %849 = dma.done.wait [#allocation15], 256  }
 0x3ae   :  { %850 = vsyncadd [#allocation15], 4294967040 }
 0x3af   :  { %486 = vsyncpa [#allocation3], 1 }
 0x3b0   :  { %487 = vsyncpa [#allocation6], 1 }
 0x3b1   :  { %488 = vsyncpa [#allocation9], 1 }
 0x3b2   :  { %489 = vsyncpa [#allocation4], 1 }
 0x3b3   :  { %490 = vsyncpa [#allocation12], 1 }
 0x3b4   :  { %491 = vsyncpa [#allocation15], 1 }

</bundles_post_ra>
